<compile_context>
chip_gen: v7x
topology: tpu7x:2x2x1
jax: 0.10.0
libtpu: 0.0.40
codegen_flags: <defaults>
</compile_context>

<pallas_src>
import functools

import jax
import jax.numpy as jnp
from jax import lax
from jax.experimental import pallas as pl
from jax.experimental.pallas import tpu as pltpu


def _conv_mish_kernel(x_ref, w_ref, b_ref, o_ref, xp_ref, *,
                      Nb, H, W, Hp, Cin, Cout, KH, pad, Ho, Wo):
    """Fused Conv2d (stride=1, dilation=1) + bias + Mish for Nb batch elements.

    x_ref : (Nb, Cin, H, W)          raw NCHW input block (VMEM)
    w_ref : (KH, Cin*W, Wo*Cout)     banded (Toeplitz-in-W) weights
    b_ref : (1, Wo*Cout)             bias tiled to the packed output layout
    o_ref : (Nb, Ho, Wo*Cout)        lane-dense packed output block
    xp_ref: (Nb, Hp, Cin*W)          VMEM scratch: channel-packed, H-padded x
    """
    # 1) Pack the NCHW block into (h, ci*W + w) layout with zero H padding.
    #    W padding is already folded into the banded weights.
    xp_ref[...] = jnp.zeros_like(xp_ref)
    for n in range(Nb):
        for ci in range(Cin):
            xp_ref[n, pad:pad + H, ci * W:(ci + 1) * W] = x_ref[n, ci, :, :]

    # 2) Conv as KH matmuls against the banded weights -> lane-dense
    #    (Nb*Ho, Wo*Cout) accumulator. Bias is the accumulator init.
    acc = jnp.broadcast_to(b_ref[...].astype(jnp.float32), (Nb * Ho, Wo * Cout))
    for kh in range(KH):
        xs = xp_ref[:, kh:kh + Ho, :].reshape(Nb * Ho, Cin * W)
        acc = acc + jnp.dot(xs, w_ref[kh],
                            preferred_element_type=jnp.float32)

    # 3) Mish: x * tanh(softplus(x)) via the single-exp identity
    #    tanh(softplus(x)) = u / (u + 2), u = t*(t+2), t = exp(x).
    t = jnp.exp(jnp.minimum(acc, 20.0))     # clamp: exact for x >= 20 in f32
    u = t * (t + 2.0)
    out = acc * (u / (u + 2.0))

    o_ref[...] = out.reshape(Nb, Ho, Wo * Cout).astype(o_ref.dtype)


def _pick_batch_block(N, Ho):
    """Batch elements per grid step: ~512 output rows/step, but keep >=2 steps
    when N >= 2 so both v7x TensorCores get work."""
    nb = max(1, min(N, 512 // max(Ho, 1)))
    if N >= 2:
        nb = min(nb, max(1, N // 2))
    while N % nb:                      # largest divisor of N that is <= nb
        nb -= 1
    return nb


def wn_conv_activ(x_nchw, weight_oihw, bias, *, stride=1, padding=1, dilation=1):
    """Forward pass of WNConvActiv (Conv2d + bias + Mish). NCHW in / NCHW out."""
    assert stride == 1 and dilation == 1, "kernel specialized to stride=1, dilation=1"
    N, Cin, H, W = x_nchw.shape
    Cout, Cin_w, KH, KW = weight_oihw.shape
    assert Cin == Cin_w
    pad = padding
    Hp = H + 2 * pad
    Ho = Hp - KH + 1
    Wo = W + 2 * pad - KW + 1

    # Banded (Toeplitz-in-W) weights, (KH, Cin*W, Wo*Cout):
    #   B[kh, ci*W + wi, w*Cout + co] = weight[co, ci, kh, wi - w + pad]
    # when 0 <= wi - w + pad < KW, else 0.  W padding is absorbed in the band.
    wt = jnp.transpose(weight_oihw, (2, 1, 3, 0))                  # (KH,Cin,KW,Cout)
    w_out = jnp.arange(Wo)
    w_in = jnp.arange(W)
    kw_idx = w_in[None, :] - w_out[:, None] + pad                  # (Wo, W)
    valid = (kw_idx >= 0) & (kw_idx < KW)
    kw_safe = jnp.clip(kw_idx, 0, KW - 1)
    b_toep = wt[:, :, kw_safe, :]                                  # (KH,Cin,Wo,W,Cout)
    b_toep = jnp.where(valid[None, None, :, :, None], b_toep, 0.0)
    b_toep = jnp.transpose(b_toep, (0, 1, 3, 2, 4)).reshape(KH, Cin * W, Wo * Cout)
    b_toep = b_toep.astype(jnp.float32)

    bias_t = jnp.tile(bias.astype(jnp.float32), Wo).reshape(1, Wo * Cout)

    Nb = _pick_batch_block(N, Ho)
    grid = (N // Nb,)

    kernel = functools.partial(
        _conv_mish_kernel, Nb=Nb, H=H, W=W, Hp=Hp, Cin=Cin, Cout=Cout,
        KH=KH, pad=pad, Ho=Ho, Wo=Wo)

    cost = pl.CostEstimate(
        flops=2 * N * Ho * Wo * Cout * Cin * KH * KW,
        transcendentals=N * Ho * Wo * Cout,
        bytes_accessed=4 * (x_nchw.size + grid[0] * b_toep.size
                            + N * Ho * Wo * Cout),
    )

    out_packed = pl.pallas_call(
        kernel,
        out_shape=jax.ShapeDtypeStruct((N, Ho, Wo * Cout), x_nchw.dtype),
        grid=grid,
        in_specs=[
            pl.BlockSpec((Nb, Cin, H, W), lambda n: (n, 0, 0, 0)),
            pl.BlockSpec((KH, Cin * W, Wo * Cout), lambda n: (0, 0, 0)),
            pl.BlockSpec((1, Wo * Cout), lambda n: (0, 0)),
        ],
        out_specs=pl.BlockSpec((Nb, Ho, Wo * Cout), lambda n: (n, 0, 0)),
        scratch_shapes=[pltpu.VMEM((Nb, Hp, Cin * W), jnp.float32)],
        compiler_params=pltpu.CompilerParams(
            dimension_semantics=("parallel",)),
        cost_estimate=cost,
    )(x_nchw, b_toep, bias_t)

    # Unpack the lane-dense (w, co) layout back to PyTorch NCHW.
    out = out_packed.reshape(N, Ho, Wo, Cout)
    return jnp.transpose(out, (0, 3, 1, 2))


def _reference(x_nchw, weight_oihw, bias, padding=1):
    """Pure-JAX reference: lax conv + bias + Mish (for correctness check)."""
    y = lax.conv_general_dilated(
        x_nchw.astype(jnp.float32),
        weight_oihw.astype(jnp.float32),
        window_strides=(1, 1),
        padding=[(padding, padding), (padding, padding)],
        dimension_numbers=("NCHW", "OIHW", "NCHW"),
    )
    y = y + bias.reshape(1, -1, 1, 1)
    return y * jnp.tanh(jnp.logaddexp(y, 0.0))


if __name__ == "__main__":
    # Small shapes consistent with the module: in_channels=4, out_channels=8,
    # kernel_size=3, stride=1, padding=1, dilation=1, bias=True.
    N, Cin, H, W = 2, 4, 16, 16
    Cout, K = 8, 3

    key = jax.random.PRNGKey(0)
    kx, kw, kb = jax.random.split(key, 3)

    x = jax.random.normal(kx, (N, Cin, H, W), dtype=jnp.float32)
    # Deterministic Conv2d-style init (uniform in +/- 1/sqrt(fan_in)).
    fan_in = Cin * K * K
    bound = 1.0 / (fan_in ** 0.5)
    weight = jax.random.uniform(kw, (Cout, Cin, K, K), jnp.float32, -bound, bound)
    bias = jax.random.uniform(kb, (Cout,), jnp.float32, -bound, bound)

    out = wn_conv_activ(x, weight, bias, padding=1)
    out = jax.block_until_ready(out)

    ref = _reference(x, weight, bias, padding=1)
    assert out.shape == (N, Cout, H, W), out.shape
    assert jnp.allclose(out, ref, atol=3e-5, rtol=3e-5), float(
        jnp.max(jnp.abs(out - ref))
    )

    print("KERNEL_OK")
</pallas_src>

<mosaic_0001>
module attributes {stable_mosaic.version = 11 : i64} {
  func.func @_conv_mish_kernel(%arg0: i32, %arg1: memref<1x4x16x16xf32, #tpu.memory_space<vmem>>, %arg2: memref<3x64x128xf32, #tpu.memory_space<vmem>>, %arg3: memref<1x128xf32, #tpu.memory_space<vmem>>, %arg4: memref<1x16x128xf32, #tpu.memory_space<vmem>>, %arg5: memref<1x18x64xf32, #tpu.memory_space<vmem>>) attributes {dimension_semantics = [#tpu.dimension_semantics<parallel>], iteration_bounds = array<i64: 2>, scalar_prefetch = 0 : i64, scratch_operands = 1 : i64, tpu.core_type = #tpu.core_type<tc>, window_params = [{transform_indices = @transform_0, window_bounds = array<i64: 1, 4, 16, 16>}, {pipeline_mode = #tpu.pipeline_mode<synchronous>, transform_indices = @transform_1, window_bounds = array<i64: 3, 64, 128>}, {pipeline_mode = #tpu.pipeline_mode<synchronous>, transform_indices = @transform_2, window_bounds = array<i64: 1, 128>}, {transform_indices = @transform_3, window_bounds = array<i64: 1, 16, 128>}]} {
    %cst = arith.constant 0.000000e+00 : f32
    %0 = vector.broadcast %cst : f32 to vector<1x18x64xf32>
    %c0 = arith.constant 0 : index
    %c0_0 = arith.constant 0 : index
    %c0_1 = arith.constant 0 : index
    %1 = vector.load %arg5[%c0, %c0_0, %c0_1] : memref<1x18x64xf32, #tpu.memory_space<vmem>>, vector<1x18x64xf32>
    tpu.vector_store %arg5[%c0, %c0_0, %c0_1], %0 {strides = array<i32>} : memref<1x18x64xf32, #tpu.memory_space<vmem>>, vector<1x18x64xf32>,
    %c0_2 = arith.constant 0 : index
    %c0_3 = arith.constant 0 : index
    %c0_4 = arith.constant 0 : index
    %c0_5 = arith.constant 0 : index
    %2 = vector.load %arg1[%c0_2, %c0_3, %c0_4, %c0_5] : memref<1x4x16x16xf32, #tpu.memory_space<vmem>>, vector<1x1x16x16xf32>
    %3 = vector.shape_cast %2 : vector<1x1x16x16xf32> to vector<16x16xf32>
    %c0_6 = arith.constant 0 : index
    %c1 = arith.constant 1 : index
    %c0_7 = arith.constant 0 : index
    %4 = vector.load %arg5[%c0_6, %c1, %c0_7] : memref<1x18x64xf32, #tpu.memory_space<vmem>>, vector<1x16x16xf32>
    %5 = vector.shape_cast %4 : vector<1x16x16xf32> to vector<16x16xf32>
    %6 = vector.shape_cast %3 : vector<16x16xf32> to vector<1x16x16xf32>
    tpu.vector_store %arg5[%c0_6, %c1, %c0_7], %6 {strides = array<i32>} : memref<1x18x64xf32, #tpu.memory_space<vmem>>, vector<1x16x16xf32>,
    %c0_8 = arith.constant 0 : index
    %c1_9 = arith.constant 1 : index
    %c0_10 = arith.constant 0 : index
    %c0_11 = arith.constant 0 : index
    %7 = vector.load %arg1[%c0_8, %c1_9, %c0_10, %c0_11] : memref<1x4x16x16xf32, #tpu.memory_space<vmem>>, vector<1x1x16x16xf32>
    %8 = vector.shape_cast %7 : vector<1x1x16x16xf32> to vector<16x16xf32>
    %c0_12 = arith.constant 0 : index
    %c1_13 = arith.constant 1 : index
    %c16 = arith.constant 16 : index
    %9 = vector.load %arg5[%c0_12, %c1_13, %c16] : memref<1x18x64xf32, #tpu.memory_space<vmem>>, vector<1x16x16xf32>
    %10 = vector.shape_cast %9 : vector<1x16x16xf32> to vector<16x16xf32>
    %11 = vector.shape_cast %8 : vector<16x16xf32> to vector<1x16x16xf32>
    tpu.vector_store %arg5[%c0_12, %c1_13, %c16], %11 {strides = array<i32>} : memref<1x18x64xf32, #tpu.memory_space<vmem>>, vector<1x16x16xf32>,
    %c0_14 = arith.constant 0 : index
    %c2 = arith.constant 2 : index
    %c0_15 = arith.constant 0 : index
    %c0_16 = arith.constant 0 : index
    %12 = vector.load %arg1[%c0_14, %c2, %c0_15, %c0_16] : memref<1x4x16x16xf32, #tpu.memory_space<vmem>>, vector<1x1x16x16xf32>
    %13 = vector.shape_cast %12 : vector<1x1x16x16xf32> to vector<16x16xf32>
    %c0_17 = arith.constant 0 : index
    %c1_18 = arith.constant 1 : index
    %c32 = arith.constant 32 : index
    %14 = vector.load %arg5[%c0_17, %c1_18, %c32] : memref<1x18x64xf32, #tpu.memory_space<vmem>>, vector<1x16x16xf32>
    %15 = vector.shape_cast %14 : vector<1x16x16xf32> to vector<16x16xf32>
    %16 = vector.shape_cast %13 : vector<16x16xf32> to vector<1x16x16xf32>
    tpu.vector_store %arg5[%c0_17, %c1_18, %c32], %16 {strides = array<i32>} : memref<1x18x64xf32, #tpu.memory_space<vmem>>, vector<1x16x16xf32>,
    %c0_19 = arith.constant 0 : index
    %c3 = arith.constant 3 : index
    %c0_20 = arith.constant 0 : index
    %c0_21 = arith.constant 0 : index
    %17 = vector.load %arg1[%c0_19, %c3, %c0_20, %c0_21] : memref<1x4x16x16xf32, #tpu.memory_space<vmem>>, vector<1x1x16x16xf32>
    %18 = vector.shape_cast %17 : vector<1x1x16x16xf32> to vector<16x16xf32>
    %c0_22 = arith.constant 0 : index
    %c1_23 = arith.constant 1 : index
    %c48 = arith.constant 48 : index
    %19 = vector.load %arg5[%c0_22, %c1_23, %c48] : memref<1x18x64xf32, #tpu.memory_space<vmem>>, vector<1x16x16xf32>
    %20 = vector.shape_cast %19 : vector<1x16x16xf32> to vector<16x16xf32>
    %21 = vector.shape_cast %18 : vector<16x16xf32> to vector<1x16x16xf32>
    tpu.vector_store %arg5[%c0_22, %c1_23, %c48], %21 {strides = array<i32>} : memref<1x18x64xf32, #tpu.memory_space<vmem>>, vector<1x16x16xf32>,
    %c0_24 = arith.constant 0 : index
    %c0_25 = arith.constant 0 : index
    %22 = vector.load %arg3[%c0_24, %c0_25] : memref<1x128xf32, #tpu.memory_space<vmem>>, vector<1x128xf32>
    %23 = vector.shape_cast %22 : vector<1x128xf32> to vector<1x128xf32>
    %24 = vector.broadcast %23 : vector<1x128xf32> to vector<16x128xf32>
    %c0_26 = arith.constant 0 : index
    %c0_27 = arith.constant 0 : index
    %c0_28 = arith.constant 0 : index
    %25 = vector.load %arg5[%c0_26, %c0_27, %c0_28] : memref<1x18x64xf32, #tpu.memory_space<vmem>>, vector<1x16x64xf32>
    %26 = vector.shape_cast %25 : vector<1x16x64xf32> to vector<16x64xf32>
    %c0_29 = arith.constant 0 : index
    %c0_30 = arith.constant 0 : index
    %c0_31 = arith.constant 0 : index
    %27 = vector.load %arg2[%c0_29, %c0_30, %c0_31] : memref<3x64x128xf32, #tpu.memory_space<vmem>>, vector<1x64x128xf32>
    %28 = vector.shape_cast %27 : vector<1x64x128xf32> to vector<64x128xf32>
    %cst_32 = arith.constant dense<0.000000e+00> : vector<16x128xf32>
    %29 = tpu.matmul %26, %28, %cst_32 {dimension_numbers = #tpu.dot_dimension_numbers<[1], [0], [0], [1], [0, 0, 1, 1], [], []>} : vector<16x64xf32>, vector<64x128xf32>, vector<16x128xf32> -> vector<16x128xf32>
    %30 = arith.addf %24, %29 : vector<16x128xf32>
    %c0_33 = arith.constant 0 : index
    %c1_34 = arith.constant 1 : index
    %c0_35 = arith.constant 0 : index
    %31 = vector.load %arg5[%c0_33, %c1_34, %c0_35] : memref<1x18x64xf32, #tpu.memory_space<vmem>>, vector<1x16x64xf32>
    %32 = vector.shape_cast %31 : vector<1x16x64xf32> to vector<16x64xf32>
    %c1_36 = arith.constant 1 : index
    %c0_37 = arith.constant 0 : index
    %c0_38 = arith.constant 0 : index
    %33 = vector.load %arg2[%c1_36, %c0_37, %c0_38] : memref<3x64x128xf32, #tpu.memory_space<vmem>>, vector<1x64x128xf32>
    %34 = vector.shape_cast %33 : vector<1x64x128xf32> to vector<64x128xf32>
    %cst_39 = arith.constant dense<0.000000e+00> : vector<16x128xf32>
    %35 = tpu.matmul %32, %34, %cst_39 {dimension_numbers = #tpu.dot_dimension_numbers<[1], [0], [0], [1], [0, 0, 1, 1], [], []>} : vector<16x64xf32>, vector<64x128xf32>, vector<16x128xf32> -> vector<16x128xf32>
    %36 = arith.addf %30, %35 : vector<16x128xf32>
    %c0_40 = arith.constant 0 : index
    %c2_41 = arith.constant 2 : index
    %c0_42 = arith.constant 0 : index
    %37 = vector.load %arg5[%c0_40, %c2_41, %c0_42] : memref<1x18x64xf32, #tpu.memory_space<vmem>>, vector<1x16x64xf32>
    %38 = vector.shape_cast %37 : vector<1x16x64xf32> to vector<16x64xf32>
    %c2_43 = arith.constant 2 : index
    %c0_44 = arith.constant 0 : index
    %c0_45 = arith.constant 0 : index
    %39 = vector.load %arg2[%c2_43, %c0_44, %c0_45] : memref<3x64x128xf32, #tpu.memory_space<vmem>>, vector<1x64x128xf32>
    %40 = vector.shape_cast %39 : vector<1x64x128xf32> to vector<64x128xf32>
    %cst_46 = arith.constant dense<0.000000e+00> : vector<16x128xf32>
    %41 = tpu.matmul %38, %40, %cst_46 {dimension_numbers = #tpu.dot_dimension_numbers<[1], [0], [0], [1], [0, 0, 1, 1], [], []>} : vector<16x64xf32>, vector<64x128xf32>, vector<16x128xf32> -> vector<16x128xf32>
    %42 = arith.addf %36, %41 : vector<16x128xf32>
    %cst_47 = arith.constant 2.000000e+01 : f32
    %43 = vector.broadcast %cst_47 : f32 to vector<16x128xf32>
    %44 = arith.minimumf %42, %43 : vector<16x128xf32>
    %45 = math.exp %44 : vector<16x128xf32>
    %cst_48 = arith.constant 2.000000e+00 : f32
    %46 = vector.broadcast %cst_48 : f32 to vector<16x128xf32>
    %47 = arith.addf %45, %46 : vector<16x128xf32>
    %48 = arith.mulf %45, %47 : vector<16x128xf32>
    %cst_49 = arith.constant 2.000000e+00 : f32
    %49 = vector.broadcast %cst_49 : f32 to vector<16x128xf32>
    %50 = arith.addf %48, %49 : vector<16x128xf32>
    %51 = arith.divf %48, %50 : vector<16x128xf32>
    %52 = arith.mulf %42, %51 : vector<16x128xf32>
    %53 = vector.shape_cast %52 : vector<16x128xf32> to vector<1x16x128xf32>
    %c0_50 = arith.constant 0 : index
    %c0_51 = arith.constant 0 : index
    %c0_52 = arith.constant 0 : index
    %54 = vector.load %arg4[%c0_50, %c0_51, %c0_52] : memref<1x16x128xf32, #tpu.memory_space<vmem>>, vector<1x16x128xf32>
    tpu.vector_store %arg4[%c0_50, %c0_51, %c0_52], %53 {strides = array<i32>} : memref<1x16x128xf32, #tpu.memory_space<vmem>>, vector<1x16x128xf32>,
    return
  }
  func.func @transform_0(%arg0: i32) -> (i32, i32, i32, i32) {
    %c0_i32 = arith.constant 0 : i32
    %c0_i32_0 = arith.constant 0 : i32
    %c0_i32_1 = arith.constant 0 : i32
    %c0_i32_2 = arith.constant 0 : i32
    return %arg0, %c0_i32, %c0_i32_0, %c0_i32_1 : i32, i32, i32, i32
  }
  func.func @transform_1(%arg0: i32) -> (i32, i32, i32) {
    %c0_i32 = arith.constant 0 : i32
    %c0_i32_0 = arith.constant 0 : i32
    %c0_i32_1 = arith.constant 0 : i32
    %c0_i32_2 = arith.constant 0 : i32
    return %c0_i32, %c0_i32_0, %c0_i32_1 : i32, i32, i32
  }
  func.func @transform_2(%arg0: i32) -> (i32, i32) {
    %c0_i32 = arith.constant 0 : i32
    %c0_i32_0 = arith.constant 0 : i32
    %c0_i32_1 = arith.constant 0 : i32
    return %c0_i32, %c0_i32_0 : i32, i32
  }
  func.func @transform_3(%arg0: i32) -> (i32, i32, i32) {
    %c0_i32 = arith.constant 0 : i32
    %c0_i32_0 = arith.constant 0 : i32
    %c0_i32_1 = arith.constant 0 : i32
    return %arg0, %c0_i32, %c0_i32_0 : i32, i32, i32
  }
}

</mosaic_0001>

<bundles_post_ra>
// kernel: tpu_custom_call.1
= control target key start
LH: loop header
LB: loop body
LE: loop exit
PB: predicated region body
PF: predicated region fallthrough
CT: control target
= control target key end

     0   :  { %8 = vsyncpa [#allocation4], 0  ;;  %s1298_s0 = inlined_call_operand.hbm [shape: f32[2,4,16,16], index: 0, kind: input, shape index: {}]   ;;  %s1299_s1 = inlined_call_operand.hbm [shape: f32[3,64,128], index: 1, kind: input, shape index: {}]   ;;  %s1300_s2 = inlined_call_operand.vmem [shape: f32[1,128], index: 2, kind: input, shape index: {}]   ;;  %s1301_s3 = inlined_call_operand.hbm [shape: f32[2,16,128], index: 3, kind: output, shape index: {}]  }
   0x1   :  { %10 = vsyncpa [#allocation4 + $0x1], 0 }
   0x2   :  { %11 = vsyncpa [#allocation7], 0 }
   0x3   :  { %12 = vsyncpa [#allocation5], 0 }
   0x4   :  { %14 = vsyncpa [#allocation5 + $0x1], 0  ;;  %s1067_s12 = smov 0   ;;  %s1069_s13 = smov 0  }
   0x5   :  { %s1071_s14 = smov 0   ;;  %s1073_s15 = smov 0  }
   0x6 LB: > { %s1088_s16 = sadd.s32 4294967295, %s1034_s15   ;;  %s661_s17 = sadd.s32 4294967294, %s1034_s15   ;;  %s1034_s15 = sphi %s1073_s15, %s1321_s15   ;;  %s1030_s14 = sphi %s1071_s14, %s1320_s14   ;;  %s1026_s13 = sphi %s1069_s13, %s1319_s13   ;;  %s1022_s12 = sphi %s1067_s12, %s1318_s12  }
   0x7   : > { %p40_p0 = scmp.ne.s32.totalorder %s1026_s13, %s1022_s12  ;;  %p1302_p1 = scmp.eq.s32.totalorder %s1088_s16, 0 }
   0x8   : > { %p112_p3 = scmp.eq.s32.totalorder %s661_s17, 1  ;;  %p662_p5 = scmp.ge.s32.totalorder %s1034_s15, 1 }
   0x9   : > { %p1097_p4 = por %p1302_p1, %p40_p0  ;;  %p119_p7 = scmp.lt.s32.totalorder %s1034_s15, 3 }
   0xa   : > { %p1102_p6 = por %p112_p3, %p40_p0  ;;  %s1036_s21 = smov [#allocation6]  }
   0xb   : > { %s1305_s18 = scalar_select %p1097_p4, 1, 0 }
   0xc   : > { %s1306_s19 = scalar_select %p1102_p6, 1, 0 }
   0xd   : > { %p1107_p8 = pnand %p662_p5, %p119_p7  ;;  %s131_s22 = sshll.u32 %s1036_s21, 4  ;;  %s1111_s22 = int_to_ptr.vmem [resolvable:$true] %s131_s22 }
   0xe   : > { %s1123_s24 = sadd.s32 1, %s1034_s15   ;;  %s27_s25 = sadd.s32 1, %s1030_s14 }
   0xf   : > { %s1307_s20 = scalar_select %p1107_p8, 1, 0 }
  0x10   : > { %p841_p9 = pneg %p1107_p8  ;;  %s24_s26 = ssub.s32 %s1034_s15, %s1123_s24 }
  0x11   : > { %s906_s29 = scalar_lea.hbm %s1299_s1, 3072 }
  0x12   : > { %p1118_p11 = pnand %p841_p9, %p1302_p1  ;;  %p907_p12 = scmp.ne.s32.totalorder %s1299_s1, %s906_s29 }
  0x13   : > { %p913_p5 = scmp.lt.u32.totalorder %s906_s29, %s1299_s1 }
  0x14   : > { %p908_p13 = pneg %p1118_p11 }
  0x16   : > { %p909_p0 = pnand %p908_p13, %p907_p12 }
  0x18   : > { %p910_p3 = pneg %p909_p0 }
  0x1a   : > { %p915_p7 = pnand %p913_p5, %p910_p3 }
  0x1c   : > { %918 = shalt.err (!%p915_p7)
}
  0x1d   : > { %s919_s7 = scalar_lea.vmem %s1111_s22, 3072  ;;  %p927_p2 = scmp.lt.s32.totalorder %s1111_s22, %s1111_s22 }
  0x1e   : > { %p920_p9 = scmp.ne.s32.totalorder %s1111_s22, %s919_s7  ;;  %p928_p6 = scmp.lt.s32.totalorder %s919_s7, %s919_s7 }
  0x20   : > { %p922_p10 = pnand %p920_p9, %p908_p13  ;;  %p929_p4 = por %p928_p6, %p927_p2 }
  0x22   : > { %p923_p1 = pneg %p922_p10 }
  0x24   : > { %p930_p8 = pnand %p929_p4, %p923_p1 }
  0x26   : > { %933 = shalt.err (!%p930_p8)
}
  0x27   : > { %s1037_s8 = smov 128   ;;  %s1038_s9 = smov 8  }
  0x28   : > { %844 = dma.hbm_to_vmem [thread:$0]  (!%p1118_p11), %s1299_s1, 3072, %s1111_s22, [#allocation7], %s1037_s8, %s1037_s8, %s1038_s9  }
  0x29   : > { %p25_p1 = scmp.eq.s32.totalorder %s24_s26, 0  ;;  %p34_p2 = scmp.ne.s32.totalorder %s1030_s14, %s1026_s13 }
  0x2a   : > { %p35_p4 = scmp.eq.s32.totalorder %s1034_s15, 0  ;;  %p854_p6 = scmp.lt.s32.totalorder %s1034_s15, 2 }
  0x2b   : > { %s1157_s17 = scalar_select %p25_p1, %s1030_s14, %s27_s25  }
  0x2c   : > { %p36_p8 = por %p35_p4, %p34_p2  ;;  %p1309_p10 = scmp.eq.s32.totalorder %s1088_s16, 1 }
  0x2d   : > { %s148_s23 = sand.u32 1, %s1030_s14   ;;  %s690_s27 = sshll.u32 %s1034_s15, 10 }
  0x2e   : > { %p1161_p12 = por %p1309_p10, %p34_p2  ;;  %s665_s28 = sshll.u32 %s148_s23, 6 }
  0x2f   : > { %s1170_s4 = scalar_lea.hbm %s1298_s0, %s690_s27  ;;  %s152_s22 = scalar_lea.vmem [#allocation3], %s665_s28 }
  0x30   : > { %s159_s25 = sshll.u32 %s152_s22, 4  ;;  %p1172_p11 = pnand %p854_p6, %p36_p8  ;;  %s1176_s25 = int_to_ptr.vmem [resolvable:$true] %s159_s25 }
  0x31   : > { %s1178_s5 = scalar_lea.sflag [#allocation4], %s148_s23  ;;  %s934_s6 = scalar_lea.hbm %s1170_s4, 1024 }
  0x32   : > { %p935_p13 = scmp.ne.s32.totalorder %s1170_s4, %s934_s6  ;;  %p936_p0 = pneg %p1172_p11 }
  0x33   : > { %s939_s11 = scalar_lea.hbm %s1298_s0, 2048  ;;  %p940_p7 = scmp.lt.u32.totalorder %s1170_s4, %s1298_s0 }
  0x34   : > { %p937_p3 = pnand %p936_p0, %p935_p13  ;;  %p941_p9 = scmp.lt.u32.totalorder %s939_s11, %s934_s6 }
  0x35   : > { %p943_p2 = scmp.lt.u32.totalorder %s934_s6, %s1170_s4 }
  0x36   : > { %p938_p5 = pneg %p937_p3  ;;  %p942_p1 = por %p941_p9, %p940_p7 }
  0x38   : > { %p944_p4 = por %p943_p2, %p942_p1 }
  0x3a   : > { %p945_p6 = pnand %p944_p4, %p938_p5 }
  0x3c   : > { %948 = shalt.err (!%p945_p6)
}
  0x3d   : > { %s949_s23 = scalar_lea.vmem %s1176_s25, 1024  ;;  %s1039_s29 = smov [#allocation3]  }
  0x3e   : > { %p950_p8 = scmp.ne.s32.totalorder %s1176_s25, %s949_s23  ;;  %s954_s30 = sshll.u32 %s1039_s29, 4  ;;  %s955_s30 = int_to_ptr.vmem [resolvable:$false] %s954_s30 }
  0x3f   : > { %s956_s22 = scalar_lea.vmem %s955_s30, 2048  ;;  %p957_p3 = scmp.lt.s32.totalorder %s1176_s25, %s955_s30 }
  0x40   : > { %p952_p10 = pnand %p950_p8, %p936_p0  ;;  %p958_p7 = scmp.lt.s32.totalorder %s956_s22, %s949_s23 }
  0x42   : > { %p953_p13 = pneg %p952_p10  ;;  %p959_p9 = por %p958_p7, %p957_p3 }
  0x44   : > { %p960_p1 = pnand %p959_p9, %p953_p13 }
  0x46   : > { %963 = shalt.err (!%p960_p1)
}
  0x47   : > { %848 = dma.hbm_to_vmem [thread:$0]  (!%p1172_p11), %s1170_s4, 1024, %s1176_s25, %s1178_s5, %s1037_s8, %s1037_s8, %s1038_s9  }
  0x48   : > { %p1312_p0 = scmp.ne.s32.totalorder %s1307_s20, 0 }
  0x49   : > { %s1212_s6 = sand.u32 (!%p1312_p0), 1, %s1026_s13   ;;  %p1313_p5 = scmp.ne.s32.totalorder (!%p1312_p0), %s1305_s18, 0 }
  0x4a   : > { %171 = sbr.rel (%p1312_p0) target bundleno = 502 (0x1f6), region = 32  ;;  %s669_s7 = sshll.u32 (!%p1312_p0), %s1212_s6, 6 }
  0x4b   : > { %s174_s10 = scalar_lea.sflag (!%p1312_p0), [#allocation4], %s1212_s6  ;;  %s1216_s11 = scalar_lea.vmem (!%p1312_p0), [#allocation3], %s669_s7 }
  0x51   : > { %1009 = dma.done.wait (%p1313_p5), %s174_s10, 1024  }
  0x52   : > { %1011 = vsyncadd (%p1313_p5), %s174_s10, 4294966272  ;;  %p1314_p11 = scmp.eq.s32.totalorder %s1088_s16, 0 }
  0x54   : > { %1013 = dma.done.wait (%p1314_p11), [#allocation7], 3072   ;;  %p1315_p2 = pmov %p1314_p11 }
  0x55   : > { %vm204_vm0 = vcmask 523264   ;;  %v1040_v0 = vmov 0.0   ;;  %vm207_vm1 = vcmask 517120   ;;  %v674_v1 = vld [vmem:[%s1216_s11 + $0x20] sm:$0xff]  ;;  %v672_v2 = vld [vmem:[%s1216_s11 + $0x10] sm:$0xff]  ;;  %vm211_vm2 = vcmask 130048  }
  0x56   : > { %1015 = vsyncadd (%p1315_p2), [#allocation7], 4294964224  ;;  %205 = vst.msk [vmem:[#allocation2] sm:$0xff] %vm204_vm0, %v1040_v0  ;;  %s1041_s18 = smov 32   ;;  %s1042_s20 = smov 16   ;;  %v675_v3 = vld [vmem:[%s1216_s11 + $0x28] sm:$0xff] }
  0x57   : > { %206 = vst.msk [vmem:[#allocation2 + $0x8] sm:$0xff] %vm204_vm0, %v1040_v0  ;;  %233 = vrot.lane.b32.xlu1 %v674_v1, %s1041_s18  ;;  %219 = vrot.lane.b32.xlu0 %v672_v2, %s1042_s20  ;;  %v359_v4 = vld [vmem:[#allocation6 + $0x40] sm:$0xff]  ;;  %v673_v5 = vld [vmem:[%s1216_s11 + $0x18] sm:$0xff]  ;;  %v360_v7 = vld [vmem:[#allocation6 + $0x48] sm:$0xff]  ;;  %s1043_s8 = smov 48   ;;  %vm225_vm3 = vcmask 261248  }
  0x58   : > { %208 = vst.msk [vmem:[#allocation2 + $0x10] sm:$0x3] %vm207_vm1, %v1040_v0  ;;  %v209_v6 = vld [vmem:[%s1216_s11] sm:$0xff]  ;;  %v795_v8 = vpack.c.bf16 %v360_v7, %v359_v4  ;;  %v266_v10 = vld [vmem:[#allocation6 + $0x8] sm:$0xff]  ;;  %v677_v12 = vld [vmem:[%s1216_s11 + $0x38] sm:$0xff]  ;;  %vm239_vm4 = vcmask 392448  }
  0x59   : > { %212 = vst.msk [vmem:[#allocation2 + $0x1] sm:$0xff] %vm211_vm2, %v209_v6  ;;  %v265_v9 = vld [vmem:[#allocation6] sm:$0xff]  ;;  %v210_v11 = vld [vmem:[%s1216_s11 + $0x8] sm:$0xff]  ;;  %v361_v14 = vld [vmem:[#allocation6 + $0x50] sm:$0xff]  ;;  %vm253_vm5 = vcmask 523648   ;;  %s671_s25 = sshll.u32 %s1212_s6, 4 }
  0x5a   : > { %v779_v13 = vpack.c.bf16 %v266_v10, %v265_v9  ;;  %213 = vst.msk [vmem:[#allocation2 + $0x9] sm:$0xff] %vm211_vm2, %v210_v11  ;;  %v362_v15 = vld [vmem:[#allocation6 + $0x58] sm:$0xff]  ;;  %v267_v16 = vld [vmem:[#allocation6 + $0x10] sm:$0xff]  ;;  %v363_v19 = vld [vmem:[#allocation6 + $0x60] sm:$0xff]  ;;  %796 = vmatprep.subr.bf16.mxu0 %v795_v8  ;;  %s203_s26 = scalar_lea.vmem [#allocation8], %s671_s25  ;;  %s691_s27 = sshll.u32 %s1088_s16, 8 }
  0x5b   : > { %235 = vrot.lane.b32.xlu1 %v675_v3, %s1041_s18  ;;  %221 = vrot.lane.b32.xlu0 %v673_v5, %s1042_s20  ;;  %v799_v17 = vpack.c.bf16 %v362_v15, %v361_v14  ;;  %v268_v18 = vld [vmem:[#allocation6 + $0x18] sm:$0xff]  ;;  %v364_v20 = vld [vmem:[#allocation6 + $0x68] sm:$0xff]  ;;  %v676_v21 = vld [vmem:[%s1216_s11 + $0x30] sm:$0xff]  ;;  %s578_s5 = sshll.u32 %s203_s26, 4  ;;  %s1254_s29 = scalar_lea.hbm %s1301_s3, %s691_s27  ;;  %s1249_s5 = int_to_ptr.vmem [resolvable:$true] %s578_s5 }
  0x5c   : > { %780 = vmatprep.subr.bf16.mxu1 %v779_v13  ;;  %v783_v22 = vpack.c.bf16 %v268_v18, %v267_v16  ;;  %v269_v23 = vld [vmem:[#allocation6 + $0x20] sm:$0xff]  ;;  %v270_v24 = vld [vmem:[#allocation6 + $0x28] sm:$0xff]  ;;  %798 = vmatpush3.bf16.msra.mxu0 %v795_v8  ;;  %v803_v25 = vpack.c.bf16 %v364_v20, %v363_v19  ;;  %v365_v27 = vld [vmem:[#allocation6 + $0x70] sm:$0xff]  ;;  %s565_s30 = scalar_lea.sflag [#allocation5], %s1212_s6  ;;  %s964_s22 = scalar_lea.vmem %s1249_s5, 256 }
  0x5d   : > { %782 = vmatpush3.bf16.msra.mxu1 %v779_v13  ;;  %800 = vmatprep.subr.bf16.mxu0 %v799_v17  ;;  %v787_v26 = vpack.c.bf16 %v270_v24, %v269_v23  ;;  %v366_v28 = vld [vmem:[#allocation6 + $0x78] sm:$0xff]  ;;  %v271_v29 = vld [vmem:[#allocation6 + $0x30] sm:$0xff]  ;;  %v453_v33 = vld [vmem:[#allocation6 + $0x80] sm:$0xff]  ;;  %p965_p4 = scmp.ne.s32.totalorder %s1249_s5, %s964_s22  ;;  %s1044_s16 = smov [#allocation8]  }
  0x5e   : > { %784 = vmatprep.subr.bf16.mxu1 %v783_v22  ;;  %v272_v30 = vld [vmem:[#allocation6 + $0x38] sm:$0xff]  ;;  %v807_v31 = vpack.c.bf16 %v366_v28, %v365_v27  ;;  %v454_v34 = vld [vmem:[#allocation6 + $0x88] sm:$0xff]  ;;  %v455_v42 = vld [vmem:[#allocation6 + $0x90] sm:$0xff]  ;;  %s968_s7 = sshll.u32 %s1044_s16, 4  ;;  %s969_s7 = int_to_ptr.vmem [resolvable:$false] %s968_s7 }
  0x5f   : > { %249 = vrot.lane.b32.xlu1 %v677_v12, %s1043_s8  ;;  %247 = vrot.lane.b32.xlu0 %v676_v21, %s1043_s8  ;;  %v791_v32 = vpack.c.bf16 %v272_v30, %v271_v29  ;;  %v811_v35 = vpack.c.bf16 %v454_v34, %v453_v33  ;;  %v456_v43 = vld [vmem:[#allocation6 + $0x98] sm:$0xff]  ;;  %v457_v49 = vld [vmem:[#allocation6 + $0xa0] sm:$0xff]  ;;  %v458_v50 = vld [vmem:[#allocation6 + $0xa8] sm:$0xff]  ;;  %p966_p6 = pnand %p965_p4, %p1161_p12  ;;  %s970_s10 = scalar_lea.vmem %s969_s7, 512 }
  0x60   : > { %802 = vmatpush3.bf16.msra.mxu0 %v799_v17  ;;  %v815_v47 = vpack.c.bf16 %v456_v43, %v455_v42  ;;  %v819_v52 = vpack.c.bf16 %v458_v50, %v457_v49  ;;  %v459_v53 = vld [vmem:[#allocation6 + $0xb0] sm:$0xff]  ;;  %v460_v54 = vld [vmem:[#allocation6 + $0xb8] sm:$0xff]  ;;  %v678_v59 = vld [vmem:[%s1300_s2] ss:$0 sm:$0xff]  ;;  %p971_p10 = scmp.lt.s32.totalorder %s1249_s5, %s969_s7  ;;  %p972_p13 = scmp.lt.s32.totalorder %s970_s10, %s964_s22 }
  0x61   : > { %786 = vmatpush3.bf16.msra.mxu1 %v783_v22  ;;  %804 = vmatprep.subr.bf16.mxu0 %v803_v25  ;;  %v823_v55 = vpack.c.bf16 %v460_v54, %v459_v53  ;;  %p967_p8 = pneg %p966_p6 }
  0x62   : > { %788 = vmatprep.subr.bf16.mxu1 %v787_v26  ;;  %p973_p3 = por %p972_p13, %p971_p10 }
  0x64   : > { %806 = vmatpush3.bf16.msra.mxu0 %v803_v25  ;;  %p974_p7 = pnand %p973_p3, %p967_p8 }
  0x65   : > { %790 = vmatpush3.bf16.msra.mxu1 %v787_v26  ;;  %808 = vmatprep.subr.bf16.mxu0 %v807_v31 }
  0x66   : > { %792 = vmatprep.subr.bf16.mxu1 %v791_v32 }
  0x68   : > { %810 = vmatpush3.bf16.msra.mxu0 %v807_v31 }
  0x69   : > { %794 = vmatpush3.bf16.msra.mxu1 %v791_v32  ;;  %812 = vmatprep.subr.bf16.mxu0 %v811_v35 }
  0xc9   : > { %v234_v36 = vpop.permute.xlu1 %233  ;;  %v220_v37 = vpop.permute.xlu0 %219 }
  0xca   : > { %226 = vst.msk [vmem:[#allocation2 + $0x1] sm:$0xff] %vm225_vm3, %v220_v37 }
  0xcb   : > { %240 = vst.msk [vmem:[#allocation2 + $0x1] sm:$0xff] %vm239_vm4, %v234_v36 }
  0xcd   : > { %v236_v38 = vpop.permute.xlu1 %235  ;;  %v222_v39 = vpop.permute.xlu0 %221 }
  0xce   : > { %227 = vst.msk [vmem:[#allocation2 + $0x9] sm:$0xff] %vm225_vm3, %v222_v39 }
  0xcf   : > { %241 = vst.msk [vmem:[#allocation2 + $0x9] sm:$0xff] %vm239_vm4, %v236_v38 }
  0xd1   : > { %v250_v40 = vpop.permute.xlu1 %249  ;;  %v248_v41 = vpop.permute.xlu0 %247 }
  0xd2   : > { %255 = vst.msk [vmem:[#allocation2 + $0x9] sm:$0xff] %vm253_vm5, %v250_v40  ;;  %254 = vst.msk [vmem:[#allocation2 + $0x1] sm:$0xff] %vm253_vm5, %v248_v41 }
  0xd9   : > { %v263_v44 = vld [vmem:[#allocation2] sm:$0xff]  ;;  %v264_v46 = vld [vmem:[#allocation2 + $0x8] sm:$0xff] }
  0xda   : > { %v356_v45 = vld [vmem:[#allocation2 + $0x1] sm:$0xff]  ;;  %738 = vmatprep.mubr.msk.f32.mxu1 %vm204_vm0, %v263_v44  ;;  %v357_v48 = vld [vmem:[#allocation2 + $0x9] sm:$0xff] }
  0xdb   : > { %757 = vmatprep.mubr.msk.f32.mxu0 %vm204_vm0, %v356_v45  ;;  %739 = vmatmul.mubr.msk.f32.vlgmr.msra.gmra.mrb[0].mxu1 %vm204_vm0, %v264_v46  ;;  %v450_v51 = vld [vmem:[#allocation2 + $0x2] sm:$0xff]  ;;  %v451_v56 = vld [vmem:[#allocation2 + $0xa] sm:$0xff] }
  0xdc   : > { %758 = vmatmul.mubr.msk.f32.vlgmr.msra.gmra.mrb[0].mxu0 %vm204_vm0, %v357_v48 }
  0xdd   : > { %814 = vmatpush3.bf16.msra.mxu0 %v811_v35  ;;  %776 = vmatprep.mubr.msk.f32.mxu0 %vm204_vm0, %v450_v51 }
  0xde   : > { %816 = vmatprep.subr.bf16.mxu0 %v815_v47 }
  0xe1   : > { %818 = vmatpush3.bf16.msra.mxu0 %v815_v47 }
  0xe2   : > { %820 = vmatprep.subr.bf16.mxu0 %v819_v52 }
  0xe5   : > { %822 = vmatpush3.bf16.msra.mxu0 %v819_v52 }
  0xe6   : > { %824 = vmatprep.subr.bf16.mxu0 %v823_v55 }
  0xe9   : > { %826 = vmatpush3.bf16.msra.mxu0 %v823_v55 }
  0xec   : > { %777 = vmatmul.mubr.msk.f32.vlgmr.msra.gmra.mrb[0].mxu0 %vm204_vm0, %v451_v56 }
 0x1ae   : > { %v740_v57 = vpop.f32.mrb[0].mxu1 }
 0x1af   : > { %v345_v58 = vpop.f32.mrb[1].mxu1  ;;  %v355_v60 = vadd.f32 %v740_v57, %v678_v59 }
 0x1b0   : > { %v354_v61 = vadd.f32 %v678_v59, %v345_v58 }
 0x1bf   : > { %v778_v62 = vpop.f32.mrb[0].mxu0 }
 0x1c0   : > { %v828_v63 = vadd.f32 %v778_v62, %v355_v60  ;;  %v533_v0 = vpop.f32.mrb[1].mxu0 }
 0x1c1   : > { %v830_v1 = vadd.f32 %v533_v0, %v354_v61 }
 0x1c2   : > { %v545_v2 = vmin.f32 %v828_v63, 20.0 }
 0x1c3   : > { %v544_v3 = vmin.f32 %v830_v1, 20.0 }
 0x1c4   : > { %v548_v4 = vmul.f32 1.442695, %v545_v2 }
 0x1c5   : > { %v546_v5 = vmul.f32 1.442695, %v544_v3 }
 0x1c6   : > { %898 = vpow2.f32 %v548_v4 }
 0x1c7   : > { %900 = vpow2.f32 %v546_v5 }
 0x1d0   : > { %v899_v6 = vpop.eup %898 }
 0x1d1   : > { %v901_v7 = vpop.eup %900  ;;  %v551_v8 = vadd.f32 2.0, %v899_v6 }
 0x1d2   : > { %v550_v9 = vadd.f32 2.0, %v901_v7 }
 0x1d3   : > { %v553_v10 = vmul.f32 %v899_v6, %v551_v8 }
 0x1d4   : > { %v552_v11 = vmul.f32 %v901_v7, %v550_v9 }
 0x1d5   : > { %v555_v12 = vadd.f32 2.0, %v553_v10 }
 0x1d6   : > { %v554_v13 = vadd.f32 2.0, %v552_v11 }
 0x1d7   : > { %902 = vrcp.f32 %v555_v12 }
 0x1d8   : > { %904 = vrcp.f32 %v554_v13 }
 0x1e1   : > { %v903_v14 = vpop.eup %902 }
 0x1e2   : > { %v905_v15 = vpop.eup %904  ;;  %v559_v16 = vmul.f32 %v903_v14, %v553_v10 }
 0x1e3   : > { %v557_v17 = vmul.f32 %v905_v15, %v552_v11 }
 0x1e4   : > { %v561_v18 = vmul.f32 %v828_v63, %v559_v16 }
 0x1e5   : > { %v560_v19 = vmul.f32 %v830_v1, %v557_v17 }
 0x1e6   : > { %563 = vst [vmem:[%s203_s26 + $0x8] sm:$0xff] %v561_v18 }
 0x1e7   : > { %562 = vst [vmem:[%s203_s26] sm:$0xff] %v560_v19 }
 0x1e8   : > { %977 = shalt.err (!%p974_p7)
}
 0x1e9   : > { %s978_s11 = scalar_lea.hbm %s1254_s29, 256  ;;  %s982_s8 = scalar_lea.hbm %s1301_s3, 512 }
 0x1ea   : > { %p979_p9 = scmp.ne.s32.totalorder %s1254_s29, %s978_s11  ;;  %p983_p5 = scmp.lt.u32.totalorder %s1254_s29, %s1301_s3 }
 0x1eb   : > { %p984_p11 = scmp.lt.u32.totalorder %s982_s8, %s978_s11  ;;  %p986_p4 = scmp.lt.u32.totalorder %s978_s11, %s1254_s29 }
 0x1ec   : > { %p980_p1 = pnand %p979_p9, %p1161_p12 }
 0x1ed   : > { %p985_p2 = por %p984_p11, %p983_p5 }
 0x1ee   : > { %p981_p0 = pneg %p980_p1 }
 0x1ef   : > { %p987_p6 = por %p986_p4, %p985_p2 }
 0x1f1   : > { %p988_p8 = pnand %p987_p6, %p981_p0 }
 0x1f3   : > { %991 = shalt.err (!%p988_p8)
}
 0x1f4   : > { %s1045_s25 = smov 128   ;;  %s1046_s26 = smov 8  }
 0x1f5   : > { %839 = dma.vmem_to_hbm [thread:$0]  (%p1161_p12), %s1249_s5, 256, %s1254_s29, %s565_s30, %s1045_s25, %s1045_s25, %s1046_s26  }
 0x1f6 PF: > { %s593_s27 = sand.u32 1, %s1022_s12   ;;  %p1316_p10 = scmp.ne.s32.totalorder %s1306_s19, 0 }
 0x1f7   : > { %p1317_p13 = scmp.ge.s32.totalorder %s1034_s15, 2  ;;  %s594_s28 = scalar_lea.sflag [#allocation5], %s593_s27 }
 0x1f9   : > { %p850_p3 = pnand %p1317_p13, %p1316_p10 }
 0x1fb   : > { %1017 = dma.done.wait (!%p850_p3), %s594_s28, 256  }
 0x1fc   : > { %1019 = vsyncadd (!%p850_p3), %s594_s28, 4294967040  ;;  %p17_p7 = scmp.ge.s32.totalorder %s1123_s24, 4   ;;  %s1318_s12 = smov %s1026_s13 }
 0x1fd   : > { %s1319_s13 = smov %s1030_s14  ;;  %s1320_s14 = smov %s1157_s17 }
 0x1fe   : > { %s1321_s15 = smov %s1123_s24  ;;  %19 = sbr.rel (!%p17_p7) target bundleno = 6 (0x6), region = 86 }
 0x205   :  { %599 = vsyncpa [#allocation4], 1 }
 0x206   :  { %601 = vsyncpa [#allocation4 + $0x1], 1 }
 0x207   :  { %602 = vsyncpa [#allocation7], 1 }
 0x208   :  { %603 = vsyncpa [#allocation5], 1 }
 0x209   :  { %605 = vsyncpa [#allocation5 + $0x1], 1 }

</bundles_post_ra>
